<compile_context>
chip_gen: v7x
topology: tpu7x:2x2x1
jax: 0.10.0
libtpu: 0.0.40
codegen_flags: <defaults>
</compile_context>

<pallas_src>
import functools

import jax
import jax.numpy as jnp
import numpy as np
from jax.experimental import pallas as pl
from jax.experimental.pallas import tpu as pltpu


# ---------------------------------------------------------------------------
# Linear projection kernels (y = x @ W^T [+ b]), tiled over rows.
# ---------------------------------------------------------------------------
def _linear_kernel(x_ref, wt_ref, o_ref):
    y = jnp.dot(x_ref[...].astype(jnp.bfloat16), wt_ref[...],
                preferred_element_type=jnp.float32)
    o_ref[...] = y.astype(o_ref.dtype)


def _linear_bias_kernel(x_ref, wt_ref, b_ref, o_ref):
    y = jnp.dot(x_ref[...].astype(jnp.bfloat16), wt_ref[...],
                preferred_element_type=jnp.float32)
    o_ref[...] = (y + b_ref[...]).astype(o_ref.dtype)


def linear(x2d, w_t_bf16, bias=None, out_dtype=jnp.float32):
    m, kdim = x2d.shape
    n = w_t_bf16.shape[1]
    tm = m if m <= 512 else 256   # single block at demo sizes; 128-aligned row tiles ok on v5e
    # TODO(synk): add K-/N-grid + f32 VMEM accumulator once kdim/n outgrow one block.
    in_specs = [pl.BlockSpec((tm, kdim), lambda i: (i, 0)),
                pl.BlockSpec((kdim, n), lambda i: (0, 0))]
    args = [x2d, w_t_bf16]
    kern = _linear_kernel
    if bias is not None:
        in_specs.append(pl.BlockSpec((1, n), lambda i: (0, 0)))
        args.append(bias.reshape(1, n))
        kern = _linear_bias_kernel
    return pl.pallas_call(
        kern,
        out_shape=jax.ShapeDtypeStruct((m, n), out_dtype),
        grid=(pl.cdiv(m, tm),),
        in_specs=in_specs,
        out_specs=pl.BlockSpec((tm, n), lambda i: (i, 0)),
        compiler_params=pltpu.CompilerParams(dimension_semantics=("parallel",)),
    )(*args)


# ---------------------------------------------------------------------------
# PACA attention kernel: one grid step per batch, all heads inside.
# ---------------------------------------------------------------------------
def _paca_attn_kernel(scale, num_heads, d, dim,
                      cqkv_ref, kqkv_ref, rd_ref, polar_ref,
                      mkx_ref, mxk_ref, tbl_ref,
                      kout_ref, xout_ref):
    # Head-invariant data, hoisted once per batch.
    polar = polar_ref[0].astype(jnp.int32)           # (k_l, x_l)
    bin_masks = [polar == o for o in range(8)]       # 8 small bool maps (shared by heads)
    tbl_vals = [tbl_ref[o] for o in range(8)]        # polar_emb table scalars from SMEM

    for hi in range(num_heads):
        lo = hi * d
        hi_ = lo + d
        # Per-head loads straight from the fused qkv refs (bounds live ranges).
        q_h = cqkv_ref[0, :, lo:hi_]                               # (x_l, d) bf16
        k_h = cqkv_ref[0, :, dim + lo:dim + hi_]
        v_h = cqkv_ref[0, :, 2 * dim + lo:2 * dim + hi_]
        kq_h = kqkv_ref[0, :, lo:hi_]                              # (k_l, d) bf16
        kk_h = kqkv_ref[0, :, dim + lo:dim + hi_]
        kv_h = kqkv_ref[0, :, 2 * dim + lo:2 * dim + hi_]
        rd = rd_ref[0, hi].astype(jnp.float32)                     # (k_l, x_l)
        mkx = mkx_ref[0, hi] != 0                                  # (k_l, x_l) bool
        mxk = mxk_ref[0, hi] != 0                                  # (x_l, k_l) bool

        # k_x_attn = k_q @ k^T * scale  (unmasked; used for orientation)
        s = jax.lax.dot_general(kq_h, k_h, (((1,), (1,)), ((), ())),
                                preferred_element_type=jnp.float32) * scale

        # ---- generate_main_orientation ------------------------------------
        abs_s = jnp.abs(s)
        best_val = jnp.full((abs_s.shape[0], 1), -jnp.inf, dtype=jnp.float32)
        best_idx = jnp.zeros((abs_s.shape[0], 1), dtype=jnp.int32)
        for o in range(8):
            so = jnp.sum(jnp.where(bin_masks[o], abs_s, 0.0), axis=-1, keepdims=True)
            upd = so > best_val                       # strict '>' keeps first argmax
            best_idx = jnp.where(upd, o, best_idx)
            best_val = jnp.where(upd, so, best_val)
        new_polar = (polar - best_idx + 8) & 7        # mod-8 wrap, single VPU op

        # polar_emb lookup via 8-way select against SMEM scalars
        polar_bias = jnp.zeros_like(s)
        for o in range(8):
            polar_bias = polar_bias + jnp.where(new_polar == o, tbl_vals[o], 0.0)

        add_kx = rd + polar_bias                      # shared; transposed once for x-side

        # ---- kernel-side attention (masked_fill, softmax over x_l) --------
        s_m = jnp.where(mkx, jnp.float32(-1e6), s)
        logits_k = s_m + add_kx
        mk = jnp.max(logits_k, axis=-1, keepdims=True)
        ek = jnp.exp(logits_k - mk)
        pk = ek * pl.reciprocal(jnp.sum(ek, axis=-1, keepdims=True), approx=True)
        ko = jnp.dot(pk.astype(jnp.bfloat16), v_h,
                     preferred_element_type=jnp.float32)           # (k_l, d)
        kout_ref[0, :, lo:hi_] = ko.astype(kout_ref.dtype)         # direct per-head store

        # ---- x-side attention (masked_fill, softmax over k_l) -------------
        s2 = jax.lax.dot_general(q_h, kk_h, (((1,), (1,)), ((), ())),
                                 preferred_element_type=jnp.float32) * scale
        s2_m = jnp.where(mxk, jnp.float32(-1e9), s2)
        logits_x = s2_m + add_kx.T
        mx = jnp.max(logits_x, axis=-1, keepdims=True)
        ex = jnp.exp(logits_x - mx)
        px = ex * pl.reciprocal(jnp.sum(ex, axis=-1, keepdims=True), approx=True)
        xo = jnp.dot(px.astype(jnp.bfloat16), kv_h,
                     preferred_element_type=jnp.float32)           # (x_l, d)
        xout_ref[0, :, lo:hi_] = xo.astype(xout_ref.dtype)


def paca_attention(c_qkv, k_qkv, rd_e, polar, mask_kx, mask_xk, polar_tbl,
                   scale, num_heads):
    b, x_l, three_dim = c_qkv.shape
    dim = three_dim // 3
    k_l = k_qkv.shape[1]
    d = dim // num_heads
    kernel = functools.partial(_paca_attn_kernel, float(scale), num_heads, d, dim)

    in_specs = [
        pl.BlockSpec((1, x_l, 3 * dim), lambda bi: (bi, 0, 0)),               # fused qkv(x)
        pl.BlockSpec((1, k_l, 3 * dim), lambda bi: (bi, 0, 0)),               # fused qkv(kernal)
        pl.BlockSpec((1, num_heads, k_l, x_l), lambda bi: (bi, 0, 0, 0)),     # rd (bf16)
        pl.BlockSpec((1, k_l, x_l), lambda bi: (bi, 0, 0)),                   # polar (int8)
        pl.BlockSpec((1, num_heads, k_l, x_l), lambda bi: (bi, 0, 0, 0)),     # mask kx (int8)
        pl.BlockSpec((1, num_heads, x_l, k_l), lambda bi: (bi, 0, 0, 0)),     # mask xk (int8)
        pl.BlockSpec(memory_space=pltpu.MemorySpace.SMEM),                    # polar_emb (8,)
    ]
    out_specs = (
        pl.BlockSpec((1, k_l, dim), lambda bi: (bi, 0, 0)),
        pl.BlockSpec((1, x_l, dim), lambda bi: (bi, 0, 0)),
    )
    out_shape = (
        jax.ShapeDtypeStruct((b, k_l, dim), jnp.bfloat16),
        jax.ShapeDtypeStruct((b, x_l, dim), jnp.bfloat16),
    )
    return pl.pallas_call(
        kernel,
        out_shape=out_shape,
        grid=(b,),
        in_specs=in_specs,
        out_specs=out_specs,
        compiler_params=pltpu.CompilerParams(
            dimension_semantics=("parallel",),
            # Explicit VMEM budget: demo footprint is tiny; re-derive per chip for
            # production (v7x: 64 MiB physical, split the grid if a batch block >~28 MiB).
            vmem_limit_bytes=48 * 1024 * 1024,
        ),
    )(c_qkv, k_qkv, rd_e, polar, mask_kx, mask_xk, polar_tbl)


# ---------------------------------------------------------------------------
# PACA module (parameters + forward)
# ---------------------------------------------------------------------------
def init_params(key, dim, num_heads):
    ks = jax.random.split(key, 5)
    return {
        "qkv_w": jax.random.normal(ks[0], (3 * dim, dim), jnp.float32) * 0.02,   # qkv_bias=False
        "proj_w": jax.random.normal(ks[1], (dim, dim), jnp.float32) * 0.02,
        "proj_b": jax.random.normal(ks[2], (dim,), jnp.float32) * 0.02,
        "polar_tbl": jax.random.normal(ks[3], (8,), jnp.float32) * 0.02,          # nn.Embedding(8, 1)
        "dis_tbl": jax.random.normal(ks[4], (66, num_heads), jnp.float32) * 0.02,  # nn.Embedding(66, h)
    }


def paca_pallas(params, x, kernal, rd_idx, polar_pos, att_mask, num_heads):
    b, x_l, dim = x.shape
    k_l = kernal.shape[1]
    d = dim // num_heads
    scale = d ** (-0.5)

    # --- fused qkv projection for x and kernal in ONE launch, bf16 out, no bias ---
    qkv_w_t = params["qkv_w"].T.astype(jnp.bfloat16)           # (dim, 3*dim)
    rows = jnp.concatenate([x.reshape(-1, dim), kernal.reshape(-1, dim)], axis=0)
    qkv_all = linear(rows, qkv_w_t, bias=None, out_dtype=jnp.bfloat16)
    c_qkv = qkv_all[: b * x_l].reshape(b, x_l, 3 * dim)        # fed fused into attention
    k_qkv = qkv_all[b * x_l:].reshape(b, k_l, 3 * dim)

    # --- small side inputs: bf16 rd, int8 polar, int8 masks (both layouts) --------
    rd_e = jnp.transpose(params["dis_tbl"][rd_idx], (0, 3, 1, 2)).astype(jnp.bfloat16)  # (b,h,k_l,x_l)
    polar = jnp.clip(polar_pos, 0, 7).astype(jnp.int8)                                  # (b,k_l,x_l)
    mask_xk = att_mask.astype(jnp.int8)                                                 # (b,h,x_l,k_l)
    mask_kx = jnp.transpose(att_mask, (0, 1, 3, 2)).astype(jnp.int8)                    # (b,h,k_l,x_l)

    k_out, x_out = paca_attention(c_qkv, k_qkv, rd_e, polar, mask_kx, mask_xk,
                                  params["polar_tbl"], scale, num_heads)

    # --- fused output projection for k_out and x_out in ONE launch ----------------
    proj_w_t = params["proj_w"].T.astype(jnp.bfloat16)
    out_rows = jnp.concatenate([k_out.reshape(-1, dim), x_out.reshape(-1, dim)], axis=0)
    proj_all = linear(out_rows, proj_w_t, bias=params["proj_b"], out_dtype=jnp.float32)
    k_out = proj_all[: b * k_l].reshape(b, k_l, dim)
    x_out = proj_all[b * k_l:].reshape(b, x_l, dim)
    # attn_drop / proj_drop: p=0.0 (module defaults) -> identity, omitted.
    return x_out, k_out


# ---------------------------------------------------------------------------
# Pure-JAX reference (mirrors the PyTorch forward) for correctness checking
# ---------------------------------------------------------------------------
def paca_reference(params, x, kernal, rd_idx, polar_pos, att_mask, num_heads):
    b, x_l, dim = x.shape
    k_l = kernal.shape[1]
    d = dim // num_heads
    scale = d ** (-0.5)

    def split_heads(t, n):
        return t.reshape(b, n, num_heads, d).transpose(0, 2, 1, 3)

    qkv_w_t = params["qkv_w"].T
    c = x @ qkv_w_t
    kc = kernal @ qkv_w_t
    q, k, v = (split_heads(c[..., i * dim:(i + 1) * dim], x_l) for i in range(3))
    kq, kk, kv = (split_heads(kc[..., i * dim:(i + 1) * dim], k_l) for i in range(3))

    rd_e = jnp.transpose(params["dis_tbl"][rd_idx], (0, 3, 1, 2))       # (b,h,k_l,x_l)
    kx = jnp.einsum("bhkd,bhxd->bhkx", kq, k) * scale

    polar = jnp.clip(polar_pos, 0, 7).astype(jnp.int32)
    polar_b = jnp.broadcast_to(polar[:, None], (b, num_heads, k_l, x_l))
    onehot = jax.nn.one_hot(polar_b, 8, dtype=jnp.float32)
    ori_sum = jnp.sum(jnp.abs(kx)[..., None] * onehot, axis=-2)         # (b,h,k_l,8)
    main_ori = jnp.argmax(ori_sum, axis=-1)                             # (b,h,k_l)
    new_polar = polar_b - main_ori[..., None]
    new_polar = jnp.where(new_polar < 0, new_polar + 8, new_polar)
    polar_bias = params["polar_tbl"][new_polar]                         # (b,h,k_l,x_l)

    mask_t = jnp.transpose(att_mask, (0, 1, 3, 2))
    kx_m = jnp.where(mask_t, jnp.float32(-1e6), kx)
    attn_k = jax.nn.softmax(kx_m + rd_e + polar_bias, axis=-1)
    k_out = jnp.einsum("bhkx,bhxd->bhkd", attn_k, v)
    k_out = k_out.transpose(0, 2, 1, 3).reshape(b, k_l, dim)
    k_out = k_out @ params["proj_w"].T + params["proj_b"]

    xk = jnp.einsum("bhxd,bhkd->bhxk", q, kk) * scale
    xk_m = jnp.where(att_mask, jnp.float32(-1e9), xk)
    attn_x = jax.nn.softmax(xk_m + jnp.transpose(rd_e, (0, 1, 3, 2)) +
                            jnp.transpose(polar_bias, (0, 1, 3, 2)), axis=-1)
    x_out = jnp.einsum("bhxk,bhkd->bhxd", attn_x, kv)
    x_out = x_out.transpose(0, 2, 1, 3).reshape(b, x_l, dim)
    x_out = x_out @ params["proj_w"].T + params["proj_b"]
    return x_out, k_out


# ---------------------------------------------------------------------------
if __name__ == "__main__":
    B, X_L, K_L = 2, 16, 8
    DIM, H = 32, 4

    key = jax.random.PRNGKey(0)
    kp, kx, kker, kr, kpol, km = jax.random.split(key, 6)
    params = init_params(kp, DIM, H)

    x = jax.random.normal(kx, (B, X_L, DIM), jnp.float32)
    kernal = jax.random.normal(kker, (B, K_L, DIM), jnp.float32)
    rd_idx = jax.random.randint(kr, (B, K_L, X_L), 0, 66)
    polar_pos = jax.random.randint(kpol, (B, K_L, X_L), -2, 11)   # gets clamped to [0,7]
    att_mask = jax.random.uniform(km, (B, H, X_L, K_L)) < 0.15    # bool, True = masked

    x_out, k_out = paca_pallas(params, x, kernal, rd_idx, polar_pos, att_mask, H)
    jax.block_until_ready((x_out, k_out))

    x_ref, k_ref = paca_reference(params, x, kernal, rd_idx, polar_pos, att_mask, H)
    assert x_out.shape == (B, X_L, DIM) and k_out.shape == (B, K_L, DIM)
    assert np.allclose(np.asarray(x_out), np.asarray(x_ref), atol=2e-2, rtol=2e-2)
    assert np.allclose(np.asarray(k_out), np.asarray(k_ref), atol=2e-2, rtol=2e-2)
    print("KERNEL_OK")
</pallas_src>

<mosaic_0001>
module attributes {stable_mosaic.version = 11 : i64} {
  func.func @_linear_kernel(%arg0: i32, %arg1: memref<48x32xf32, #tpu.memory_space<vmem>>, %arg2: memref<32x96xbf16, #tpu.memory_space<vmem>>, %arg3: memref<48x96xbf16, #tpu.memory_space<vmem>>) attributes {dimension_semantics = [#tpu.dimension_semantics<parallel>], iteration_bounds = array<i64: 1>, scalar_prefetch = 0 : i64, scratch_operands = 0 : i64, tpu.core_type = #tpu.core_type<tc>, window_params = [{transform_indices = @transform_0, window_bounds = array<i64: 48, 32>}, {pipeline_mode = #tpu.pipeline_mode<synchronous>, transform_indices = @transform_1, window_bounds = array<i64: 32, 96>}, {transform_indices = @transform_2, window_bounds = array<i64: 48, 96>}]} {
    %c0 = arith.constant 0 : index
    %c0_0 = arith.constant 0 : index
    %0 = vector.load %arg1[%c0, %c0_0] : memref<48x32xf32, #tpu.memory_space<vmem>>, vector<48x32xf32>
    %1 = arith.truncf %0 : vector<48x32xf32> to vector<48x32xbf16>
    %c0_1 = arith.constant 0 : index
    %c0_2 = arith.constant 0 : index
    %2 = vector.load %arg2[%c0_1, %c0_2] : memref<32x96xbf16, #tpu.memory_space<vmem>>, vector<32x96xbf16>
    %cst = arith.constant dense<0.000000e+00> : vector<48x96xf32>
    %3 = tpu.matmul %1, %2, %cst {dimension_numbers = #tpu.dot_dimension_numbers<[1], [0], [0], [1], [0, 0, 1, 1], [], []>} : vector<48x32xbf16>, vector<32x96xbf16>, vector<48x96xf32> -> vector<48x96xf32>
    %4 = arith.truncf %3 : vector<48x96xf32> to vector<48x96xbf16>
    %c0_3 = arith.constant 0 : index
    %c0_4 = arith.constant 0 : index
    %5 = vector.load %arg3[%c0_3, %c0_4] : memref<48x96xbf16, #tpu.memory_space<vmem>>, vector<48x96xbf16>
    tpu.vector_store %arg3[%c0_3, %c0_4], %4 {strides = array<i32>} : memref<48x96xbf16, #tpu.memory_space<vmem>>, vector<48x96xbf16>,
    return
  }
  func.func @transform_0(%arg0: i32) -> (i32, i32) {
    %c0_i32 = arith.constant 0 : i32
    %c0_i32_0 = arith.constant 0 : i32
    return %arg0, %c0_i32 : i32, i32
  }
  func.func @transform_1(%arg0: i32) -> (i32, i32) {
    %c0_i32 = arith.constant 0 : i32
    %c0_i32_0 = arith.constant 0 : i32
    %c0_i32_1 = arith.constant 0 : i32
    return %c0_i32, %c0_i32_0 : i32, i32
  }
  func.func @transform_2(%arg0: i32) -> (i32, i32) {
    %c0_i32 = arith.constant 0 : i32
    %c0_i32_0 = arith.constant 0 : i32
    return %arg0, %c0_i32 : i32, i32
  }
}

</mosaic_0001>

<bundles_post_ra>
// kernel: tpu_custom_call.1
= control target key start
LH: loop header
LB: loop body
LE: loop exit
PB: predicated region body
PF: predicated region fallthrough
CT: control target
= control target key end

     0   :  { %v225_v1 = vmov 0.0   ;;  %vm226_vm0 = vmmov 0   ;;  %s287_s0 = inlined_call_operand.vmem [shape: f32[48,32], index: 0, kind: input, shape index: {}]   ;;  %s288_s1 = inlined_call_operand.vmem [shape: bf16[32,96], index: 1, kind: input, shape index: {}]   ;;  %s289_s2 = inlined_call_operand.hbm [shape: bf16[48,96], index: 2, kind: output, shape index: {}]  }
   0x1   :  { %v199_v0 = vld [vmem:[%s288_s1] sm:$0xff]   ;;  %190 = vmatprep.subr.bf16.mxu1 %v225_v1  ;;  %174 = vmatprep.subr.bf16.mxu0 %v225_v1  ;;  %v200_v2 = vld [vmem:[%s288_s1 + $0x8] sm:$0xff]   ;;  %v15_v3 = vld [vmem:[%s287_s0 + $0x10] sm:$0xff] }
   0x2   :  { %192 = vmatpush3.bf16.msra.mxu1 %v199_v0  ;;  %175 = vmatpush3.bf16.msra.mxu0 %v199_v0  ;;  %v16_v4 = vld [vmem:[%s287_s0 + $0x18] sm:$0xff]  ;;  %v13_v5 = vld [vmem:[%s287_s0] sm:$0xff]  ;;  %v14_v6 = vld [vmem:[%s287_s0 + $0x8] sm:$0xff] }
   0x3   :  { %191 = vmatprep.subr.bf16.mxu1 %v225_v1  ;;  %182 = vmatprep.mubr.msk.bf16.mxu1 %vm226_vm0, %v225_v1 }
   0x4   :  { %176 = vmatprep.subr.bf16.mxu0 %v225_v1  ;;  %178 = vmatprep.mubr.msk.bf16.mxu0 %vm226_vm0, %v225_v1 }
   0x5   :  { %7 = vsyncpa [#allocation3], 0  ;;  %v20_v7 = vpack.c.bf16 %v16_v4, %v15_v3  ;;  %v19_v8 = vpack.c.bf16 %v14_v6, %v13_v5  ;;  %vm38_vm1 = vcmask 261120   ;;  %v17_v9 = vld [vmem:[%s287_s0 + $0x20] sm:$0xff]  ;;  %v18_v10 = vld [vmem:[%s287_s0 + $0x28] sm:$0xff]  ;;  %vm129_vm2 = vcmask 781312  }
   0x6   :  { %193 = vmatpush3.bf16.msra.mxu1 %v200_v2  ;;  %177 = vmatpush3.bf16.msra.mxu0 %v200_v2  ;;  %v21_v11 = vpack.c.bf16 %v18_v10, %v17_v9  ;;  %s227_s0 = smov [#allocation2]  }
   0x7   :  { %s141_s24 = sshll.u32 %s227_s0, 4  ;;  %s142_s24 = int_to_ptr.vmem [resolvable:$true] %s141_s24 }
   0x8   :  { %s201_s25 = scalar_lea.vmem %s142_s24, 384  ;;  %p206_p1 = scmp.lt.s32.totalorder %s142_s24, %s142_s24 }
   0x9   :  { %183 = vmatmul.mubr.msk.bf16.vlgmr.msra.gmra.mrb[0].mxu1 %vm38_vm1, %v20_v7  ;;  %179 = vmatmul.mubr.msk.bf16.vlgmr.msra.gmra.mrb[0].mxu0 %vm38_vm1, %v19_v8  ;;  %p202_p0 = scmp.ne.s32.totalorder %s142_s24, %s201_s25  ;;  %p207_p2 = scmp.lt.s32.totalorder %s201_s25, %s201_s25 }
   0xa   :  { %186 = vmatprep.mubr.msk.bf16.mxu1 %vm226_vm0, %v225_v1 }
   0xb   :  { %p208_p3 = por %p207_p2, %p206_p1 }
   0xd   :  { %p209_p4 = pnand %p208_p3, %p202_p0 }
  0x11   :  { %187 = vmatmul.mubr.msk.bf16.gmra.mrb[4].mxu1 %vm38_vm1, %v21_v11 }
  0xdc   :  { %v90_v12 = vpop.f32.mrb[0].mxu1  ;;  %v82_v13 = vpop.f32.mrb[0].mxu0 }
  0xdd   :  { %v165_v14 = vpack.c.bf16 %v90_v12, %v90_v12  ;;  %v184_v15 = vpop.f32.mrb[1].mxu1  ;;  %v163_v16 = vpack.c.bf16 %v82_v13, %v82_v13  ;;  %v180_v17 = vpop.f32.mrb[1].mxu0 }
  0xde   :  { %v93_v18 = vpop.f32.mrb[2].mxu1  ;;  %v85_v19 = vpop.f32.mrb[2].mxu0 }
  0xdf   :  { %132 = vst.msk [vmem:[#allocation2 + $0x8] sm:$0xf] %vm129_vm2, %v165_v14  ;;  %v166_v20 = vpack.c.bf16 %v93_v18, %v93_v18  ;;  %v185_v21 = vpop.f32.mrb[3].mxu1  ;;  %130 = vst.msk [vmem:[#allocation2] sm:$0xf] %vm129_vm2, %v163_v16  ;;  %v164_v22 = vpack.c.bf16 %v85_v19, %v85_v19  ;;  %v181_v23 = vpop.f32.mrb[3].mxu0 }
  0xe1   :  { %133 = vst.msk [vmem:[#allocation2 + $0xc] sm:$0xf] %vm129_vm2, %v166_v20  ;;  %131 = vst.msk [vmem:[#allocation2 + $0x4] sm:$0xf] %vm129_vm2, %v164_v22 }
  0xe4   :  { %v98_v24 = vpop.f32.mrb[4].mxu1 }
  0xe5   :  { %v167_v25 = vpack.c.bf16 %v98_v24, %v98_v24  ;;  %v188_v26 = vpop.f32.mrb[5].mxu1 }
  0xe6   :  { %v101_v27 = vpop.f32.mrb[6].mxu1 }
  0xe7   :  { %134 = vst.msk [vmem:[#allocation2 + $0x10] sm:$0xf] %vm129_vm2, %v167_v25  ;;  %v168_v28 = vpack.c.bf16 %v101_v27, %v101_v27  ;;  %v189_v29 = vpop.f32.mrb[7].mxu1 }
  0xe9   :  { %135 = vst.msk [vmem:[#allocation2 + $0x14] sm:$0xf] %vm129_vm2, %v168_v28 }
  0xea   :  { %212 = shalt.err (!%p209_p4)
}
  0xeb   :  { %s213_s28 = scalar_lea.hbm %s289_s2, 384 }
  0xec   :  { %p214_p5 = scmp.ne.s32.totalorder %s289_s2, %s213_s28  ;;  %p217_p6 = scmp.lt.u32.totalorder %s213_s28, %s289_s2 }
  0xee   :  { %p219_p7 = pnand %p217_p6, %p214_p5 }
  0xf0   :  { %222 = shalt.err (!%p219_p7)
}
  0xf1   :  { %s228_s5 = smov 64   ;;  %s229_s6 = smov 4  }
  0xf2   :  { %147 = dma.vmem_to_hbm [thread:$0]  %s142_s24, 384, %s289_s2, [#allocation3], %s228_s5, %s228_s5, %s229_s6  }
  0xf3   :  { %223 = dma.done.wait [#allocation3], 384  }
  0xf4   :  { %224 = vsyncadd [#allocation3], 4294966912 }
  0xf5   :  { %151 = vsyncpa [#allocation3], 1 }

</bundles_post_ra>
